<compile_context>
chip_gen: v7x
topology: tpu7x:2x2x1
jax: 0.10.0
libtpu: 0.0.40
codegen_flags: <defaults>
</compile_context>

<pallas_src>
import jax
import jax.numpy as jnp
from jax.experimental import pallas as pl
from jax.experimental.pallas import tpu as pltpu

F_PAD = 128      # hidden feature width (lane dimension)
IN_DIM = 2       # real input features (kept un-padded in HBM)
OUT_PAD = 8      # padded output width in HBM (3 real logits)
MAX_TB = 2048    # max batch-tile rows per grid step (VMEM-safe on v5e/v6e/v7x)


def _mlp_kernel(x_ref, sp_ref, w2_ref, w3_ref, w4_ref, o_ref):
    """Fused MLP tile: rank-2 linear+ReLU -> (bf16 dot + ReLU) x2 -> bf16 dot.

    sp_ref rows (f32): 0,1 = BN-folded w1 rows; 2 = folded bias1; 3 = folded
    bias2; 4 = bias3 padded to 128 lanes with a constant 1.0 at lane 127 (the
    constant-1 lane feeds the layer-4 bias through row 127 of bf16 w4).
    """
    x = x_ref[...]                                    # (TB, 2) f32

    # Layer 1: Linear(2,128) + BN + ReLU as a VPU rank-2 update (Dropout = id)
    h = (x[:, 0:1] * sp_ref[0:1, :]
         + x[:, 1:2] * sp_ref[1:2, :]
         + sp_ref[2:3, :])
    h = jnp.maximum(h, 0.0)

    # Layer 2: Linear(128,128) + BN + ReLU  (bf16 MXU dot, f32 accumulation)
    h = jnp.dot(h.astype(jnp.bfloat16), w2_ref[...],
                preferred_element_type=jnp.float32) + sp_ref[3:4, :]
    h = jnp.maximum(h, 0.0)

    # Layer 3: Linear(128,64) + ReLU  (padded to 128 lanes; lane 127 becomes 1.0)
    h = jnp.dot(h.astype(jnp.bfloat16), w3_ref[...],
                preferred_element_type=jnp.float32) + sp_ref[4:5, :]
    h = jnp.maximum(h, 0.0)

    # Layer 4: Linear(64,3) -> 8 padded lanes; bias arrives via w4 row 127 * 1.0
    o_ref[...] = jnp.dot(h.astype(jnp.bfloat16), w4_ref[...],
                         preferred_element_type=jnp.float32)


def _choose_tiling(batch):
    """Static (padded_batch, batch_tile) choice from the static batch size."""
    bp = -(-batch // 8) * 8                 # round batch up to 8 sublanes
    tb = min(MAX_TB, bp)                    # largest tile that fits the budget
    bp = -(-bp // tb) * tb                  # pad batch to a tile multiple
    return bp, tb


def prepare_params(params, eps=1e-5):
    """One-time fold of eval-mode BatchNorm + biases into padded weight tensors."""
    f32 = jnp.float32
    bf16 = jnp.bfloat16
    s1 = params["bn1_gamma"] / jnp.sqrt(params["bn1_var"] + eps)
    t1 = params["bn1_beta"] - params["bn1_mean"] * s1
    s2 = params["bn2_gamma"] / jnp.sqrt(params["bn2_var"] + eps)
    t2 = params["bn2_beta"] - params["bn2_mean"] * s2

    w1f = params["w1"].astype(f32) * s1[None, :]        # (2, 128)
    b1f = params["b1"] * s1 + t1                        # (128,)
    w2f = params["w2"].astype(f32) * s2[None, :]        # (128, 128)
    b2f = params["b2"] * s2 + t2                        # (128,)

    # bias3 padded to 128 lanes; lane 127 = 1.0 -> constant-1 lane after ReLU
    b3p = jnp.zeros((F_PAD,), f32).at[:64].set(params["b3"]).at[127].set(1.0)

    sp = jnp.zeros((8, F_PAD), f32)
    sp = sp.at[0, :].set(w1f[0]).at[1, :].set(w1f[1])
    sp = sp.at[2, :].set(b1f).at[3, :].set(b2f).at[4, :].set(b3p)

    # w3 padded to (128,128); column 127 stays zero so h3[:,127] == ReLU(0+1) == 1
    w3p = jnp.zeros((F_PAD, F_PAD), f32).at[:, :64].set(params["w3"])
    # w4 padded to (128, 8); row 127 carries the layer-4 bias (picked up by the
    # constant-1 lane), rows 64..126 and cols 3..7 stay zero.
    w4p = jnp.zeros((F_PAD, OUT_PAD), f32).at[:64, :3].set(params["w4"])
    w4p = w4p.at[127, :3].set(params["b4"])

    # Matmul operands live in bf16 (MXU-native); biases / layer-1 rows stay f32.
    return {"sp": sp,
            "w2": w2f.astype(bf16),
            "w3": w3p.astype(bf16),
            "w4": w4p.astype(bf16)}


@jax.jit
def location_classifier_forward(x, prepped):
    """x: (B, 2) float32 -> logits (B, 3) float32 (inference semantics)."""
    B = x.shape[0]
    Bp, TB = _choose_tiling(B)

    # Only per-call glue: row padding (zero rows are harmless, sliced off below).
    xp = jnp.pad(x.astype(jnp.float32), ((0, Bp - B), (0, 0)))   # (Bp, 2)

    def param_spec(shape):
        return pl.BlockSpec(shape, lambda i: (0, 0))

    out = pl.pallas_call(
        _mlp_kernel,
        out_shape=jax.ShapeDtypeStruct((Bp, OUT_PAD), jnp.float32),
        grid_spec=pltpu.PrefetchScalarGridSpec(
            num_scalar_prefetch=0,
            grid=(Bp // TB,),
            in_specs=[
                pl.BlockSpec((TB, IN_DIM), lambda i: (i, 0)),   # x tile (2 lanes)
                param_spec((8, F_PAD)),                         # packed w1 rows + biases (f32)
                param_spec((F_PAD, F_PAD)),                     # w2 (BN folded, bf16)
                param_spec((F_PAD, F_PAD)),                     # w3 (zero-padded, bf16)
                param_spec((F_PAD, OUT_PAD)),                   # w4 (+bias row 127, bf16)
            ],
            out_specs=pl.BlockSpec((TB, OUT_PAD), lambda i: (i, 0)),
        ),
        compiler_params=pltpu.CompilerParams(
            dimension_semantics=("parallel",)),
    )(xp, prepped["sp"], prepped["w2"], prepped["w3"], prepped["w4"])

    return out[:B, :3]


def _kaiming_uniform(key, fan_in, fan_out):
    # matches nn.init.kaiming_uniform_ defaults: bound = sqrt(2)*sqrt(3/fan_in)
    bound = jnp.sqrt(2.0) * jnp.sqrt(3.0 / fan_in)
    # stored transposed relative to torch: (in_features, out_features)
    return jax.random.uniform(key, (fan_in, fan_out), jnp.float32, -bound, bound)


def init_params(key):
    k1, k2, k3, k4 = jax.random.split(key, 4)
    return {
        "w1": _kaiming_uniform(k1, 2, 128),   "b1": jnp.zeros((128,), jnp.float32),
        "w2": _kaiming_uniform(k2, 128, 128), "b2": jnp.zeros((128,), jnp.float32),
        "w3": _kaiming_uniform(k3, 128, 64),  "b3": jnp.zeros((64,), jnp.float32),
        "w4": _kaiming_uniform(k4, 64, 3),    "b4": jnp.zeros((3,), jnp.float32),
        # BatchNorm1d params at PyTorch initialization (eval mode)
        "bn1_gamma": jnp.ones((128,), jnp.float32), "bn1_beta": jnp.zeros((128,), jnp.float32),
        "bn1_mean": jnp.zeros((128,), jnp.float32), "bn1_var": jnp.ones((128,), jnp.float32),
        "bn2_gamma": jnp.ones((128,), jnp.float32), "bn2_beta": jnp.zeros((128,), jnp.float32),
        "bn2_mean": jnp.zeros((128,), jnp.float32), "bn2_var": jnp.ones((128,), jnp.float32),
    }


def _reference_forward(x, params, eps=1e-5):
    h = x @ params["w1"] + params["b1"]
    h = (h - params["bn1_mean"]) / jnp.sqrt(params["bn1_var"] + eps) * params["bn1_gamma"] + params["bn1_beta"]
    h = jnp.maximum(h, 0.0)
    h = h @ params["w2"] + params["b2"]
    h = (h - params["bn2_mean"]) / jnp.sqrt(params["bn2_var"] + eps) * params["bn2_gamma"] + params["bn2_beta"]
    h = jnp.maximum(h, 0.0)
    h = jnp.maximum(h @ params["w3"] + params["b3"], 0.0)
    return h @ params["w4"] + params["b4"]


if __name__ == "__main__":
    key = jax.random.PRNGKey(0)
    pkey, xkey = jax.random.split(key)
    params = init_params(pkey)
    prepped = prepare_params(params)       # one-time folding/padding (off the hot path)

    # bf16 matmul operands with f32 accumulation -> slightly loosened tolerance
    ATOL, RTOL = 5e-2, 1e-2

    # small example batch of 2-D location features
    x = jax.random.normal(xkey, (8, 2), jnp.float32)
    logits = jax.block_until_ready(location_classifier_forward(x, prepped))
    ref = _reference_forward(x, params)
    assert logits.shape == (8, 3), logits.shape
    assert jnp.allclose(logits, ref, atol=ATOL, rtol=RTOL), "mismatch vs reference (B=8)"

    # batch that exercises batch padding with a single big tile
    x2 = jax.random.normal(jax.random.PRNGKey(1), (300, 2), jnp.float32)
    logits2 = jax.block_until_ready(location_classifier_forward(x2, prepped))
    ref2 = _reference_forward(x2, params)
    assert logits2.shape == (300, 3), logits2.shape
    assert jnp.allclose(logits2, ref2, atol=ATOL, rtol=RTOL), "mismatch vs reference (B=300)"

    # batch that exercises the multi-step grid (Bp > MAX_TB) + padding path
    x3 = jax.random.normal(jax.random.PRNGKey(2), (2100, 2), jnp.float32)
    logits3 = jax.block_until_ready(location_classifier_forward(x3, prepped))
    ref3 = _reference_forward(x3, params)
    assert logits3.shape == (2100, 3), logits3.shape
    assert jnp.allclose(logits3, ref3, atol=ATOL, rtol=RTOL), "mismatch vs reference (B=2100)"

    print("KERNEL_OK")
</pallas_src>

<mosaic_0001>
module attributes {stable_mosaic.version = 11 : i64} {
  func.func @_mlp_kernel(%arg0: i32, %arg1: memref<8x2xf32, #tpu.memory_space<vmem>>, %arg2: memref<8x128xf32, #tpu.memory_space<vmem>>, %arg3: memref<128x128xbf16, #tpu.memory_space<vmem>>, %arg4: memref<128x128xbf16, #tpu.memory_space<vmem>>, %arg5: memref<128x8xbf16, #tpu.memory_space<vmem>>, %arg6: memref<8x8xf32, #tpu.memory_space<vmem>>) attributes {dimension_semantics = [#tpu.dimension_semantics<parallel>], iteration_bounds = array<i64: 1>, scalar_prefetch = 0 : i64, scratch_operands = 0 : i64, tpu.core_type = #tpu.core_type<tc>, window_params = [{transform_indices = @transform_0, window_bounds = array<i64: 8, 2>}, {pipeline_mode = #tpu.pipeline_mode<synchronous>, transform_indices = @transform_1, window_bounds = array<i64: 8, 128>}, {pipeline_mode = #tpu.pipeline_mode<synchronous>, transform_indices = @transform_2, window_bounds = array<i64: 128, 128>}, {pipeline_mode = #tpu.pipeline_mode<synchronous>, transform_indices = @transform_3, window_bounds = array<i64: 128, 128>}, {pipeline_mode = #tpu.pipeline_mode<synchronous>, transform_indices = @transform_4, window_bounds = array<i64: 128, 8>}, {transform_indices = @transform_5, window_bounds = array<i64: 8, 8>}]} {
    %c0 = arith.constant 0 : index
    %c0_0 = arith.constant 0 : index
    %0 = vector.load %arg1[%c0, %c0_0] : memref<8x2xf32, #tpu.memory_space<vmem>>, vector<8x2xf32>
    %1 = vector.extract_strided_slice %0 {offsets = [0, 0], sizes = [8, 1], strides = [1, 1]} : vector<8x2xf32> to vector<8x1xf32>
    %c0_1 = arith.constant 0 : index
    %c0_2 = arith.constant 0 : index
    %2 = vector.load %arg2[%c0_1, %c0_2] : memref<8x128xf32, #tpu.memory_space<vmem>>, vector<1x128xf32>
    %3 = vector.broadcast %1 : vector<8x1xf32> to vector<8x128xf32>
    %4 = vector.broadcast %2 : vector<1x128xf32> to vector<8x128xf32>
    %5 = arith.mulf %3, %4 : vector<8x128xf32>
    %6 = vector.extract_strided_slice %0 {offsets = [0, 1], sizes = [8, 1], strides = [1, 1]} : vector<8x2xf32> to vector<8x1xf32>
    %c1 = arith.constant 1 : index
    %c0_3 = arith.constant 0 : index
    %7 = vector.load %arg2[%c1, %c0_3] : memref<8x128xf32, #tpu.memory_space<vmem>>, vector<1x128xf32>
    %8 = vector.broadcast %6 : vector<8x1xf32> to vector<8x128xf32>
    %9 = vector.broadcast %7 : vector<1x128xf32> to vector<8x128xf32>
    %10 = arith.mulf %8, %9 : vector<8x128xf32>
    %11 = arith.addf %5, %10 : vector<8x128xf32>
    %c2 = arith.constant 2 : index
    %c0_4 = arith.constant 0 : index
    %12 = vector.load %arg2[%c2, %c0_4] : memref<8x128xf32, #tpu.memory_space<vmem>>, vector<1x128xf32>
    %13 = vector.broadcast %12 : vector<1x128xf32> to vector<8x128xf32>
    %14 = arith.addf %11, %13 : vector<8x128xf32>
    %cst = arith.constant 0.000000e+00 : f32
    %15 = vector.broadcast %cst : f32 to vector<8x128xf32>
    %16 = arith.maximumf %14, %15 : vector<8x128xf32>
    %17 = arith.truncf %16 : vector<8x128xf32> to vector<8x128xbf16>
    %c0_5 = arith.constant 0 : index
    %c0_6 = arith.constant 0 : index
    %18 = vector.load %arg3[%c0_5, %c0_6] : memref<128x128xbf16, #tpu.memory_space<vmem>>, vector<128x128xbf16>
    %cst_7 = arith.constant dense<0.000000e+00> : vector<8x128xf32>
    %19 = tpu.matmul %17, %18, %cst_7 {dimension_numbers = #tpu.dot_dimension_numbers<[1], [0], [0], [1], [0, 0, 1, 1], [], []>} : vector<8x128xbf16>, vector<128x128xbf16>, vector<8x128xf32> -> vector<8x128xf32>
    %c3 = arith.constant 3 : index
    %c0_8 = arith.constant 0 : index
    %20 = vector.load %arg2[%c3, %c0_8] : memref<8x128xf32, #tpu.memory_space<vmem>>, vector<1x128xf32>
    %21 = vector.broadcast %20 : vector<1x128xf32> to vector<8x128xf32>
    %22 = arith.addf %19, %21 : vector<8x128xf32>
    %cst_9 = arith.constant 0.000000e+00 : f32
    %23 = vector.broadcast %cst_9 : f32 to vector<8x128xf32>
    %24 = arith.maximumf %22, %23 : vector<8x128xf32>
    %25 = arith.truncf %24 : vector<8x128xf32> to vector<8x128xbf16>
    %c0_10 = arith.constant 0 : index
    %c0_11 = arith.constant 0 : index
    %26 = vector.load %arg4[%c0_10, %c0_11] : memref<128x128xbf16, #tpu.memory_space<vmem>>, vector<128x128xbf16>
    %cst_12 = arith.constant dense<0.000000e+00> : vector<8x128xf32>
    %27 = tpu.matmul %25, %26, %cst_12 {dimension_numbers = #tpu.dot_dimension_numbers<[1], [0], [0], [1], [0, 0, 1, 1], [], []>} : vector<8x128xbf16>, vector<128x128xbf16>, vector<8x128xf32> -> vector<8x128xf32>
    %c4 = arith.constant 4 : index
    %c0_13 = arith.constant 0 : index
    %28 = vector.load %arg2[%c4, %c0_13] : memref<8x128xf32, #tpu.memory_space<vmem>>, vector<1x128xf32>
    %29 = vector.broadcast %28 : vector<1x128xf32> to vector<8x128xf32>
    %30 = arith.addf %27, %29 : vector<8x128xf32>
    %cst_14 = arith.constant 0.000000e+00 : f32
    %31 = vector.broadcast %cst_14 : f32 to vector<8x128xf32>
    %32 = arith.maximumf %30, %31 : vector<8x128xf32>
    %33 = arith.truncf %32 : vector<8x128xf32> to vector<8x128xbf16>
    %c0_15 = arith.constant 0 : index
    %c0_16 = arith.constant 0 : index
    %34 = vector.load %arg5[%c0_15, %c0_16] : memref<128x8xbf16, #tpu.memory_space<vmem>>, vector<128x8xbf16>
    %cst_17 = arith.constant dense<0.000000e+00> : vector<8x8xf32>
    %35 = tpu.matmul %33, %34, %cst_17 {dimension_numbers = #tpu.dot_dimension_numbers<[1], [0], [0], [1], [0, 0, 1, 1], [], []>} : vector<8x128xbf16>, vector<128x8xbf16>, vector<8x8xf32> -> vector<8x8xf32>
    %c0_18 = arith.constant 0 : index
    %c0_19 = arith.constant 0 : index
    %36 = vector.load %arg6[%c0_18, %c0_19] : memref<8x8xf32, #tpu.memory_space<vmem>>, vector<8x8xf32>
    tpu.vector_store %arg6[%c0_18, %c0_19], %35 {strides = array<i32>} : memref<8x8xf32, #tpu.memory_space<vmem>>, vector<8x8xf32>,
    return
  }
  func.func @transform_0(%arg0: i32) -> (i32, i32) {
    %c0_i32 = arith.constant 0 : i32
    %c0_i32_0 = arith.constant 0 : i32
    return %arg0, %c0_i32 : i32, i32
  }
  func.func @transform_1(%arg0: i32) -> (i32, i32) {
    %c0_i32 = arith.constant 0 : i32
    %c0_i32_0 = arith.constant 0 : i32
    %c0_i32_1 = arith.constant 0 : i32
    return %c0_i32, %c0_i32_0 : i32, i32
  }
  func.func @transform_2(%arg0: i32) -> (i32, i32) {
    %c0_i32 = arith.constant 0 : i32
    %c0_i32_0 = arith.constant 0 : i32
    %c0_i32_1 = arith.constant 0 : i32
    return %c0_i32, %c0_i32_0 : i32, i32
  }
  func.func @transform_3(%arg0: i32) -> (i32, i32) {
    %c0_i32 = arith.constant 0 : i32
    %c0_i32_0 = arith.constant 0 : i32
    %c0_i32_1 = arith.constant 0 : i32
    return %c0_i32, %c0_i32_0 : i32, i32
  }
  func.func @transform_4(%arg0: i32) -> (i32, i32) {
    %c0_i32 = arith.constant 0 : i32
    %c0_i32_0 = arith.constant 0 : i32
    %c0_i32_1 = arith.constant 0 : i32
    return %c0_i32, %c0_i32_0 : i32, i32
  }
  func.func @transform_5(%arg0: i32) -> (i32, i32) {
    %c0_i32 = arith.constant 0 : i32
    %c0_i32_0 = arith.constant 0 : i32
    return %arg0, %c0_i32 : i32, i32
  }
}

</mosaic_0001>

<bundles_post_ra>
// kernel: location_classifier_forward.1
= control target key start
LH: loop header
LB: loop body
LE: loop exit
PB: predicated region body
PF: predicated region fallthrough
CT: control target
= control target key end

     0   :  { %10 = vsyncpa [#allocation3], 0  ;;  %s572_s18 = smov [#allocation2]   ;;  %s720_s0 = inlined_call_operand.vmem [shape: f32[8,2], index: 0, kind: input, shape index: {}]   ;;  %s721_s1 = inlined_call_operand.vmem [shape: f32[8,128], index: 1, kind: input, shape index: {}]   ;;  %s722_s2 = inlined_call_operand.vmem [shape: bf16[128,128], index: 2, kind: input, shape index: {}]   ;;  %s723_s3 = inlined_call_operand.hbm [shape: bf16[128,128], index: 3, kind: input, shape index: {}]   ;;  %s724_s4 = inlined_call_operand.vmem [shape: bf16[128,8], index: 4, kind: input, shape index: {}]   ;;  %s725_s5 = inlined_call_operand.vmem [shape: f32[8,8], index: 5, kind: output, shape index: {}]  }
   0x1   :  { %s22_s19 = sshll.u32 %s572_s18, 4  ;;  %s548_s22 = scalar_lea.hbm %s723_s3, 1024  ;;  %s23_s19 = int_to_ptr.vmem [resolvable:$true] %s22_s19 }
   0x2   :  { %p549_p0 = scmp.ne.s32.totalorder %s723_s3, %s548_s22  ;;  %p552_p1 = scmp.lt.u32.totalorder %s548_s22, %s723_s3 }
   0x4   :  { %p554_p2 = pnand %p552_p1, %p549_p0 }
   0x6   :  { %557 = shalt.err (!%p554_p2)
}
   0x7   :  { %s558_s27 = scalar_lea.vmem %s23_s19, 1024  ;;  %p563_p4 = scmp.lt.s32.totalorder %s23_s19, %s23_s19 }
   0x8   :  { %p559_p3 = scmp.ne.s32.totalorder %s23_s19, %s558_s27  ;;  %p564_p5 = scmp.lt.s32.totalorder %s558_s27, %s558_s27 }
   0xa   :  { %p565_p6 = por %p564_p5, %p563_p4 }
   0xc   :  { %p566_p7 = pnand %p565_p6, %p559_p3 }
   0xe   :  { %569 = shalt.err (!%p566_p7)
}
   0xf   :  { %s573_s28 = smov 64   ;;  %s574_s29 = smov 4  }
  0x10   :  { %28 = dma.hbm_to_vmem [thread:$0]  %s723_s3, 1024, %s23_s19, [#allocation3], %s573_s28, %s573_s28, %s574_s29  }
  0x11   :  { %570 = dma.done.wait [#allocation3], 1024  }
  0x12   :  { %571 = vsyncadd [#allocation3], 4294966272  ;;  %v575_v0 = vmov 0   ;;  %v576_v1 = vmov 0.0   ;;  %v35_v2 = vld [vmem:[%s720_s0] sm:$0xff]  ;;  %v525_v4 = vld [vmem:[%s722_s2 + $0x8] sm:$0xff]  }
  0x13   :  { %522 = vset.pattern.permute.xlu0 %v575_v0  ;;  %455 = vmatprep.subr.bf16.mxu0 %v576_v1  ;;  %v524_v3 = vld [vmem:[%s722_s2] sm:$0xff]   ;;  %v577_v5 = vmov 1   ;;  %v526_v6 = vld [vmem:[%s722_s2 + $0x10] sm:$0xff]   ;;  %v527_v7 = vld [vmem:[%s722_s2 + $0x18] sm:$0xff]   ;;  %vm578_vm0 = vmmov 0   ;;  %vm392_vm1 = vcmask 64512  }
  0x14   :  { %475 = vmatprep.subr.bf16.mxu1 %v576_v1  ;;  %39 = vperm.xlu0 %522, %v35_v2   ;;  %v528_v8 = vld [vmem:[%s722_s2 + $0x20] sm:$0xff]   ;;  %v529_v10 = vld [vmem:[%s722_s2 + $0x28] sm:$0xff]   ;;  %v534_v12 = vld [vmem:[#allocation2 + $0x10] sm:$0xff]  }
  0x15   :  { %456 = vmatpush3.bf16.msra.mxu0 %v524_v3  ;;  %471 = vmatprep.mubr.msk.bf16.mxu0 %vm578_vm0, %v576_v1  ;;  %v532_v9 = vld [vmem:[#allocation2] sm:$0xff]   ;;  %v533_v11 = vld [vmem:[#allocation2 + $0x8] sm:$0xff]   ;;  %v530_v13 = vld [vmem:[%s722_s2 + $0x30] sm:$0xff]  }
  0x16   :  { %457 = vmatprep.subr.bf16.mxu0 %v576_v1  ;;  %491 = vmatprep.mubr.msk.bf16.mxu1 %vm578_vm0, %v576_v1  ;;  %v535_v14 = vld [vmem:[#allocation2 + $0x18] sm:$0xff]   ;;  %v536_v16 = vld [vmem:[#allocation2 + $0x20] sm:$0xff]   ;;  %v537_v17 = vld [vmem:[#allocation2 + $0x28] sm:$0xff]  }
  0x17   :  { %476 = vmatpush3.bf16.msra.mxu1 %v532_v9  ;;  %v531_v15 = vld [vmem:[%s722_s2 + $0x38] sm:$0xff]   ;;  %v399_v19 = vld [vmem:[%s721_s1] ss:$0 sm:$0xff]  ;;  %v400_v20 = vld [vmem:[%s721_s1 + $0x1] ss:$0 sm:$0xff] }
  0x18   :  { %523 = vset.pattern.permute.xlu0 %v577_v5  ;;  %477 = vmatprep.subr.bf16.mxu1 %v576_v1  ;;  %v401_v24 = vld [vmem:[%s721_s1 + $0x2] ss:$0 sm:$0xff]  ;;  %v538_v29 = vld [vmem:[#allocation2 + $0x30] sm:$0xff]   ;;  %v539_v30 = vld [vmem:[#allocation2 + $0x38] sm:$0xff]  }
  0x19   :  { %49 = vperm.xlu0 %523, %v35_v2   ;;  %458 = vmatpush3.bf16.msra.mxu0 %v525_v4  ;;  %v540_v31 = vld [vmem:[%s724_s4] sm:$0xff]   ;;  %v541_v32 = vld [vmem:[%s724_s4 + $0x8] sm:$0xff]   ;;  %v542_v33 = vld [vmem:[%s724_s4 + $0x10] sm:$0xff]  }
  0x1a   :  { %459 = vmatprep.subr.bf16.mxu0 %v576_v1  ;;  %v543_v34 = vld [vmem:[%s724_s4 + $0x18] sm:$0xff]   ;;  %v544_v35 = vld [vmem:[%s724_s4 + $0x20] sm:$0xff]   ;;  %v545_v36 = vld [vmem:[%s724_s4 + $0x28] sm:$0xff]  }
  0x1b   :  { %478 = vmatpush3.bf16.msra.mxu1 %v533_v11  ;;  %v402_v37 = vld [vmem:[%s721_s1 + $0x3] ss:$0 sm:$0xff]  ;;  %v546_v45 = vld [vmem:[%s724_s4 + $0x30] sm:$0xff]   ;;  %v547_v46 = vld [vmem:[%s724_s4 + $0x38] sm:$0xff]  }
  0x1c   :  { %479 = vmatprep.subr.bf16.mxu1 %v576_v1  ;;  %v411_v47 = vld [vmem:[%s721_s1 + $0x4] ss:$0 sm:$0xff] }
  0x1d   :  { %460 = vmatpush3.bf16.msra.mxu0 %v526_v6 }
  0x1e   :  { %461 = vmatprep.subr.bf16.mxu0 %v576_v1 }
  0x1f   :  { %480 = vmatpush3.bf16.msra.mxu1 %v534_v12 }
  0x20   :  { %481 = vmatprep.subr.bf16.mxu1 %v576_v1 }
  0x21   :  { %462 = vmatpush3.bf16.msra.mxu0 %v527_v7 }
  0x22   :  { %463 = vmatprep.subr.bf16.mxu0 %v576_v1 }
  0x23   :  { %482 = vmatpush3.bf16.msra.mxu1 %v535_v14 }
  0x24   :  { %483 = vmatprep.subr.bf16.mxu1 %v576_v1 }
  0x25   :  { %464 = vmatpush3.bf16.msra.mxu0 %v528_v8 }
  0x26   :  { %465 = vmatprep.subr.bf16.mxu0 %v576_v1 }
  0x27   :  { %484 = vmatpush3.bf16.msra.mxu1 %v536_v16 }
  0x28   :  { %485 = vmatprep.subr.bf16.mxu1 %v576_v1 }
  0x29   :  { %466 = vmatpush3.bf16.msra.mxu0 %v529_v10 }
  0x2a   :  { %467 = vmatprep.subr.bf16.mxu0 %v576_v1 }
  0x2b   :  { %486 = vmatpush3.bf16.msra.mxu1 %v537_v17 }
  0x2c   :  { %487 = vmatprep.subr.bf16.mxu1 %v576_v1 }
  0x2d   :  { %468 = vmatpush3.bf16.msra.mxu0 %v530_v13 }
  0x2e   :  { %469 = vmatprep.subr.bf16.mxu0 %v576_v1 }
  0x2f   :  { %488 = vmatpush3.bf16.msra.mxu1 %v538_v29 }
  0x30   :  { %489 = vmatprep.subr.bf16.mxu1 %v576_v1 }
  0x31   :  { %470 = vmatpush3.bf16.msra.mxu0 %v531_v15 }
  0x32   :  { %495 = vmatprep.subr.bf16.mxu0 %v576_v1 }
  0x33   :  { %490 = vmatpush3.bf16.msra.mxu1 %v539_v30 }
  0x93   :  { %v40_v18 = vpop.permute.xlu0 %39 }
  0x94   :  { %v46_v22 = vmul.f32 %v399_v19, %v40_v18 }
  0x98   :  { %v50_v21 = vpop.permute.xlu0 %49 }
  0x99   :  { %v56_v23 = vmul.f32 %v400_v20, %v50_v21 }
  0x9b   :  { %v57_v25 = vadd.f32 %v56_v23, %v46_v22 }
  0x9d   :  { %v63_v26 = vadd.f32 %v401_v24, %v57_v25 }
  0x9f   :  { %v64_v27 = vmax.f32 %v63_v26, 0.0 }
  0xa1   :  { %v65_v28 = vpack.c.bf16 %v64_v27, %v64_v27 }
  0xa3   :  { %472 = vmatmul.mubr.bf16.vlgmr.msra.gmra.mrb[0].mxu0 %v65_v28 }
  0xa4   :  { %511 = vmatprep.mubr.msk.bf16.mxu0 %vm578_vm0, %v576_v1  ;;  %496 = vmatpush3.bf16.msra.mxu0 %v540_v31 }
  0xa5   :  { %497 = vmatprep.subr.bf16.mxu0 %v576_v1 }
  0xa8   :  { %498 = vmatpush3.bf16.msra.mxu0 %v541_v32 }
  0xa9   :  { %499 = vmatprep.subr.bf16.mxu0 %v576_v1 }
  0xac   :  { %500 = vmatpush3.bf16.msra.mxu0 %v542_v33 }
  0xad   :  { %501 = vmatprep.subr.bf16.mxu0 %v576_v1 }
  0xb0   :  { %502 = vmatpush3.bf16.msra.mxu0 %v543_v34 }
  0xb1   :  { %503 = vmatprep.subr.bf16.mxu0 %v576_v1 }
  0xb4   :  { %504 = vmatpush3.bf16.msra.mxu0 %v544_v35 }
  0xb5   :  { %505 = vmatprep.subr.bf16.mxu0 %v576_v1 }
  0xb8   :  { %506 = vmatpush3.bf16.msra.mxu0 %v545_v36 }
  0xb9   :  { %507 = vmatprep.subr.bf16.mxu0 %v576_v1 }
  0xbc   :  { %508 = vmatpush3.bf16.msra.mxu0 %v546_v45 }
  0xbd   :  { %509 = vmatprep.subr.bf16.mxu0 %v576_v1 }
  0xc0   :  { %510 = vmatpush3.bf16.msra.mxu0 %v547_v46 }
 0x176   :  { %v169_v38 = vpop.f32.mrb[0].mxu0 }
 0x177   :  { %v170_v39 = vadd.f32 %v402_v37, %v169_v38  ;;  %v473_v40 = vpop.f32.mrb[1].mxu0 }
 0x178   :  { %v172_v41 = vpop.f32.mrb[2].mxu0 }
 0x179   :  { %v175_v42 = vmax.f32 %v170_v39, 0.0  ;;  %v474_v43 = vpop.f32.mrb[3].mxu0 }
 0x17b   :  { %v176_v44 = vpack.c.bf16 %v175_v42, %v175_v42 }
 0x17d   :  { %492 = vmatmul.mubr.bf16.vlgmr.msra.gmra.mrb[0].mxu1 %v176_v44 }
 0x250   :  { %v280_v48 = vpop.f32.mrb[0].mxu1 }
 0x251   :  { %v281_v49 = vadd.f32 %v411_v47, %v280_v48  ;;  %v493_v50 = vpop.f32.mrb[1].mxu1 }
 0x252   :  { %v283_v51 = vpop.f32.mrb[2].mxu1 }
 0x253   :  { %v286_v52 = vmax.f32 %v281_v49, 0.0  ;;  %v494_v53 = vpop.f32.mrb[3].mxu1 }
 0x255   :  { %v287_v54 = vpack.c.bf16 %v286_v52, %v286_v52 }
 0x257   :  { %512 = vmatmul.mubr.bf16.vlgmr.msra.gmra.mrb[4].mxu0 %v287_v54 }
 0x32a   :  { %v386_v55 = vpop.f32.mrb[4].mxu0 }
 0x32b   :  { %393 = vst.msk [vmem:[%s725_s5] sm:$0xff] %vm392_vm1, %v386_v55  ;;  %v513_v56 = vpop.f32.mrb[5].mxu0 }
 0x32c   :  { %v389_v57 = vpop.f32.mrb[6].mxu0 }
 0x32d   :  { %v514_v58 = vpop.f32.mrb[7].mxu0 }
 0x32e   :  { %398 = vsyncpa [#allocation3], 1 }

</bundles_post_ra>
